<compile_context>
chip_gen: v5e
topology: v5e:2x2
jax: 0.10.0
libtpu: 0.0.40
codegen_flags: <defaults>
</compile_context>

<pallas_src>
import functools

import jax
import jax.numpy as jnp
from jax.experimental import pallas as pl
from jax.experimental.pallas import tpu as pltpu

# ResNet-18 stem hyper-parameters.
C_IN = 3
C_OUT = 64
KH = KW = 7
CONV_STRIDE = 2
CONV_PAD = 3
POOL_K = 3
POOL_STRIDE = 2
POOL_PAD = 1
BN_EPS = 1e-5


def _stem_kernel(p_ref, w_ref, scale_ref, bias_ref, o_ref, y_ref, *, h1, w1, h2, w2):
    """conv1 (im2col matmul, bf16 MXU / f32 acc) + BN + ReLU + 3x3/s2 maxpool, one image.

    p_ref:     (1, h1*w1, K)     bf16 im2col patches (row-major conv-output order)
    w_ref:     (K, C_OUT)        bf16 conv1 weights
    scale_ref: (1, C_OUT)        f32 folded BN scale
    bias_ref:  (1, C_OUT)        f32 folded BN bias
    o_ref:     (1, h2*w2, C_OUT) f32 pooled output (row-major pooled order)
    y_ref:     (h1*w1, C_OUT)    f32 VMEM scratch holding the ReLU'd conv activation
    """
    # ---- conv1 as a single MXU matmul + BN affine + ReLU (f32 epilogue) ----
    acc = jnp.dot(p_ref[0], w_ref[...], preferred_element_type=jnp.float32)   # (P, C)
    y_ref[...] = jnp.maximum(acc * scale_ref[...] + bias_ref[...], 0.0)

    # ---- max-pool, W direction (vectorized over all conv rows at once) ----
    # flat conv index = r*w1 + c ; flat pooled-col index p = r*w2 + j (w1 == 2*w2)
    hp = h1 * w2
    even = y_ref[pl.ds(0, hp, stride=2), :]            # y[r, 2j]
    odd = y_ref[pl.ds(1, hp, stride=2), :]             # y[r, 2j+1]
    cm = jnp.maximum(even, odd)
    # left neighbour y[r, 2j-1] == odd[p-1]; invalid at j == 0 (that's the pool padding).
    left = jnp.concatenate(
        [jnp.zeros((1, C_OUT), jnp.float32), odd[:hp - 1, :]], axis=0)
    jpos = jax.lax.broadcasted_iota(jnp.int32, (hp, C_OUT), 0) % w2
    # ReLU guarantees y >= 0, so substituting 0 for the padded border is exact.
    cm = jnp.maximum(cm, jnp.where(jpos == 0, 0.0, left))                      # (h1*w2, C)

    # ---- max-pool, H direction (short loop over pooled rows; vector ops only) ----
    rows = []
    for i in range(h2):
        m = jnp.maximum(cm[(2 * i) * w2:(2 * i + 1) * w2, :],
                        cm[(2 * i + 1) * w2:(2 * i + 2) * w2, :])
        if i > 0:                                      # top neighbour row 2i-1 (padding at i=0)
            m = jnp.maximum(m, cm[(2 * i - 1) * w2:(2 * i) * w2, :])
        rows.append(m)
    o_ref[0] = jnp.concatenate(rows, axis=0)           # (h2*w2, C)


def att_cls_forward(x_nchw, conv_w, bn_gamma, bn_beta, bn_mean, bn_var):
    n, c_in, h, w = x_nchw.shape
    assert c_in == C_IN
    h1 = (h + 2 * CONV_PAD - KH) // CONV_STRIDE + 1
    w1 = (w + 2 * CONV_PAD - KW) // CONV_STRIDE + 1
    h2 = (h1 + 2 * POOL_PAD - POOL_K) // POOL_STRIDE + 1
    w2 = (w1 + 2 * POOL_PAD - POOL_K) // POOL_STRIDE + 1
    # The fused even/odd pooling assumes an even-sized conv1 output (true for even H, W).
    assert h1 % 2 == 0 and w1 % 2 == 0 and 2 * h2 == h1 and 2 * w2 == w1

    # ---- glue: NCHW -> NHWC (bf16) and im2col patch extraction ----
    x_nhwc = jnp.transpose(x_nchw, (0, 2, 3, 1)).astype(jnp.bfloat16)
    xp = jnp.pad(x_nhwc, ((0, 0), (CONV_PAD, CONV_PAD), (CONV_PAD, CONV_PAD), (0, 0)))
    pats = []
    for di in range(KH):
        for dj in range(KW):
            pats.append(
                xp[:, di:di + CONV_STRIDE * (h1 - 1) + 1:CONV_STRIDE,
                      dj:dj + CONV_STRIDE * (w1 - 1) + 1:CONV_STRIDE, :]
            )
    k = KH * KW * c_in                                  # 147 -- intentionally NOT zero-padded
    patches = jnp.concatenate(pats, axis=-1).reshape(n, h1 * w1, k)   # (kh,kw,cin) order, bf16

    # conv weight (Cout, Cin, KH, KW) -> (KH*KW*Cin, Cout), bf16 for the MXU
    w_mat = jnp.transpose(conv_w, (2, 3, 1, 0)).reshape(k, C_OUT).astype(jnp.bfloat16)

    # fold eval-mode BN into per-channel scale/bias (kept f32 for the epilogue)
    inv_std = 1.0 / jnp.sqrt(bn_var + BN_EPS)
    scale = (bn_gamma * inv_std).reshape(1, C_OUT).astype(jnp.float32)
    bias = (bn_beta - bn_mean * bn_gamma * inv_std).reshape(1, C_OUT).astype(jnp.float32)

    # ---- one fused Pallas kernel: conv1 + BN + ReLU + maxpool, grid over batch ----
    pooled = pl.pallas_call(
        functools.partial(_stem_kernel, h1=h1, w1=w1, h2=h2, w2=w2),
        out_shape=jax.ShapeDtypeStruct((n, h2 * w2, C_OUT), jnp.float32),
        grid=(n,),
        in_specs=[
            pl.BlockSpec((1, h1 * w1, k), lambda b: (b, 0, 0)),
            pl.BlockSpec((k, C_OUT), lambda b: (0, 0)),
            pl.BlockSpec((1, C_OUT), lambda b: (0, 0)),
            pl.BlockSpec((1, C_OUT), lambda b: (0, 0)),
        ],
        out_specs=pl.BlockSpec((1, h2 * w2, C_OUT), lambda b: (b, 0, 0)),
        scratch_shapes=[pltpu.VMEM((h1 * w1, C_OUT), jnp.float32)],
        compiler_params=pltpu.CompilerParams(dimension_semantics=("parallel",)),
    )(patches, w_mat, scale, bias)

    # torch.flatten(x, 1) flattens an NCHW tensor in (C, H, W) order
    return jnp.transpose(pooled, (0, 2, 1)).reshape(n, -1)


def reference_forward(x, conv_w, gamma, beta, mean, var):
    """Pure-JAX f32 reference of the same forward (NCHW throughout)."""
    y = jax.lax.conv_general_dilated(
        x, conv_w,
        window_strides=(CONV_STRIDE, CONV_STRIDE),
        padding=[(CONV_PAD, CONV_PAD), (CONV_PAD, CONV_PAD)],
        dimension_numbers=("NCHW", "OIHW", "NCHW"),
        precision=jax.lax.Precision.HIGHEST,
    )
    inv_std = 1.0 / jnp.sqrt(var + BN_EPS)
    y = y * (gamma * inv_std)[None, :, None, None] + (beta - mean * gamma * inv_std)[None, :, None, None]
    y = jnp.maximum(y, 0.0)
    y = jnp.pad(y, ((0, 0), (0, 0), (POOL_PAD, POOL_PAD), (POOL_PAD, POOL_PAD)),
                constant_values=-jnp.inf)
    y = jax.lax.reduce_window(
        y, -jnp.inf, jax.lax.max,
        (1, 1, POOL_K, POOL_K), (1, 1, POOL_STRIDE, POOL_STRIDE), "VALID",
    )
    return y.reshape(y.shape[0], -1)


if __name__ == "__main__":
    key = jax.random.PRNGKey(0)
    k1, k2, k3, k4 = jax.random.split(key, 4)

    N, H, W = 2, 32, 32
    x = jax.random.normal(k1, (N, C_IN, H, W), dtype=jnp.float32)

    # deterministic synthetic parameters (shapes dictated by resnet18 conv1 / bn1)
    conv_w = 0.1 * jax.random.normal(k2, (C_OUT, C_IN, KH, KW), dtype=jnp.float32)
    bn_gamma = 1.0 + 0.1 * jax.random.normal(k3, (C_OUT,), dtype=jnp.float32)
    bn_beta = 0.1 * jax.random.normal(k4, (C_OUT,), dtype=jnp.float32)
    bn_mean = jnp.zeros((C_OUT,), jnp.float32)   # PyTorch default running stats
    bn_var = jnp.ones((C_OUT,), jnp.float32)

    out = att_cls_forward(x, conv_w, bn_gamma, bn_beta, bn_mean, bn_var)
    out = jax.block_until_ready(out)

    ref = reference_forward(x, conv_w, bn_gamma, bn_beta, bn_mean, bn_var)
    assert out.shape == (N, C_OUT * (H // 4) * (W // 4)), out.shape
    max_err = float(jnp.max(jnp.abs(out - ref)))
    # bf16 MXU operands with f32 accumulation -> relaxed tolerance vs. the f32 reference.
    assert jnp.allclose(out, ref, atol=2e-2, rtol=2e-2), f"max_err={max_err}"

    print("KERNEL_OK")
</pallas_src>

<mosaic_0001>
module attributes {stable_mosaic.version = 11 : i64} {
  func.func @_stem_kernel(%arg0: i32, %arg1: memref<1x256x147xbf16, #tpu.memory_space<vmem>>, %arg2: memref<147x64xbf16, #tpu.memory_space<vmem>>, %arg3: memref<1x64xf32, #tpu.memory_space<vmem>>, %arg4: memref<1x64xf32, #tpu.memory_space<vmem>>, %arg5: memref<1x64x64xf32, #tpu.memory_space<vmem>>, %arg6: memref<256x64xf32, #tpu.memory_space<vmem>>) attributes {dimension_semantics = [#tpu.dimension_semantics<parallel>], iteration_bounds = array<i64: 2>, scalar_prefetch = 0 : i64, scratch_operands = 1 : i64, tpu.core_type = #tpu.core_type<tc>, window_params = [{transform_indices = @transform_0, window_bounds = array<i64: 1, 256, 147>}, {pipeline_mode = #tpu.pipeline_mode<synchronous>, transform_indices = @transform_1, window_bounds = array<i64: 147, 64>}, {pipeline_mode = #tpu.pipeline_mode<synchronous>, transform_indices = @transform_2, window_bounds = array<i64: 1, 64>}, {pipeline_mode = #tpu.pipeline_mode<synchronous>, transform_indices = @transform_3, window_bounds = array<i64: 1, 64>}, {transform_indices = @transform_4, window_bounds = array<i64: 1, 64, 64>}]} {
    %c0 = arith.constant 0 : index
    %c0_0 = arith.constant 0 : index
    %c0_1 = arith.constant 0 : index
    %0 = vector.load %arg1[%c0, %c0_0, %c0_1] : memref<1x256x147xbf16, #tpu.memory_space<vmem>>, vector<1x256x147xbf16>
    %1 = vector.shape_cast %0 : vector<1x256x147xbf16> to vector<256x147xbf16>
    %c0_2 = arith.constant 0 : index
    %c0_3 = arith.constant 0 : index
    %2 = vector.load %arg2[%c0_2, %c0_3] : memref<147x64xbf16, #tpu.memory_space<vmem>>, vector<147x64xbf16>
    %cst = arith.constant dense<0.000000e+00> : vector<256x64xf32>
    %3 = tpu.matmul %1, %2, %cst {dimension_numbers = #tpu.dot_dimension_numbers<[1], [0], [0], [1], [0, 0, 1, 1], [], []>} : vector<256x147xbf16>, vector<147x64xbf16>, vector<256x64xf32> -> vector<256x64xf32>
    %c0_4 = arith.constant 0 : index
    %c0_5 = arith.constant 0 : index
    %4 = vector.load %arg3[%c0_4, %c0_5] : memref<1x64xf32, #tpu.memory_space<vmem>>, vector<1x64xf32>
    %5 = vector.broadcast %4 : vector<1x64xf32> to vector<256x64xf32>
    %6 = arith.mulf %3, %5 : vector<256x64xf32>
    %c0_6 = arith.constant 0 : index
    %c0_7 = arith.constant 0 : index
    %7 = vector.load %arg4[%c0_6, %c0_7] : memref<1x64xf32, #tpu.memory_space<vmem>>, vector<1x64xf32>
    %8 = vector.broadcast %7 : vector<1x64xf32> to vector<256x64xf32>
    %9 = arith.addf %6, %8 : vector<256x64xf32>
    %cst_8 = arith.constant 0.000000e+00 : f32
    %10 = vector.broadcast %cst_8 : f32 to vector<256x64xf32>
    %11 = arith.maximumf %9, %10 : vector<256x64xf32>
    %c0_9 = arith.constant 0 : index
    %c0_10 = arith.constant 0 : index
    %12 = vector.load %arg6[%c0_9, %c0_10] : memref<256x64xf32, #tpu.memory_space<vmem>>, vector<256x64xf32>
    tpu.vector_store %arg6[%c0_9, %c0_10], %11 {strides = array<i32>} : memref<256x64xf32, #tpu.memory_space<vmem>>, vector<256x64xf32>,
    %c0_11 = arith.constant 0 : index
    %c0_12 = arith.constant 0 : index
    %13 = tpu.strided_load %arg6[%c0_11, %c0_12] {strides = array<i32: 2, 1>} : memref<256x64xf32, #tpu.memory_space<vmem>>, vector<128x64xf32>
    %c1 = arith.constant 1 : index
    %c0_13 = arith.constant 0 : index
    %14 = tpu.strided_load %arg6[%c1, %c0_13] {strides = array<i32: 2, 1>} : memref<256x64xf32, #tpu.memory_space<vmem>>, vector<128x64xf32>
    %15 = arith.maximumf %13, %14 : vector<128x64xf32>
    %cst_14 = arith.constant 0.000000e+00 : f32
    %16 = vector.broadcast %cst_14 : f32 to vector<1x64xf32>
    %17 = vector.extract_strided_slice %14 {offsets = [0, 0], sizes = [127, 64], strides = [1, 1]} : vector<128x64xf32> to vector<127x64xf32>
    %18 = tpu.concatenate %16, %17 in 0 : vector<1x64xf32>, vector<127x64xf32> -> vector<128x64xf32>
    %19 = tpu.iota {dimensions = array<i32: 0>} : vector<128x64xi32>
    %c8_i32 = arith.constant 8 : i32
    %c0_i32 = arith.constant 0 : i32
    %20 = arith.cmpi eq, %c8_i32, %c0_i32 : i32
    %c1_i32 = arith.constant 1 : i32
    %21 = arith.select %20, %c1_i32, %c8_i32 : i32
    %22 = vector.broadcast %21 : i32 to vector<128x64xi32>
    %23 = arith.remsi %19, %22 : vector<128x64xi32>
    %c0_i32_15 = arith.constant 0 : i32
    %24 = vector.broadcast %c0_i32_15 : i32 to vector<128x64xi32>
    %25 = arith.cmpi ne, %23, %24 : vector<128x64xi32>
    %c0_i32_16 = arith.constant 0 : i32
    %26 = vector.broadcast %c0_i32_16 : i32 to vector<128x64xi32>
    %27 = arith.cmpi slt, %23, %26 : vector<128x64xi32>
    %c0_i32_17 = arith.constant 0 : i32
    %28 = arith.cmpi slt, %21, %c0_i32_17 : i32
    %29 = vector.broadcast %28 : i1 to vector<128x64xi1>
    %30 = vector.broadcast %29 : vector<128x64xi1> to vector<128x64xi1>
    %31 = arith.xori %27, %30 : vector<128x64xi1>
    %32 = arith.andi %31, %25 : vector<128x64xi1>
    %33 = vector.broadcast %21 : i32 to vector<128x64xi32>
    %34 = arith.addi %23, %33 : vector<128x64xi32>
    %35 = arith.select %32, %34, %23 : vector<128x64xi1>, vector<128x64xi32>
    %c0_i32_18 = arith.constant 0 : i32
    %36 = vector.broadcast %c0_i32_18 : i32 to vector<128x64xi32>
    %37 = arith.cmpi eq, %35, %36 : vector<128x64xi32>
    %cst_19 = arith.constant 0.000000e+00 : f32
    %38 = vector.broadcast %cst_19 : f32 to vector<128x64xf32>
    %39 = arith.select %37, %38, %18 : vector<128x64xi1>, vector<128x64xf32>
    %40 = arith.maximumf %15, %39 : vector<128x64xf32>
    %41 = vector.extract_strided_slice %40 {offsets = [0, 0], sizes = [8, 64], strides = [1, 1]} : vector<128x64xf32> to vector<8x64xf32>
    %42 = vector.extract_strided_slice %40 {offsets = [8, 0], sizes = [8, 64], strides = [1, 1]} : vector<128x64xf32> to vector<8x64xf32>
    %43 = arith.maximumf %41, %42 : vector<8x64xf32>
    %44 = vector.extract_strided_slice %40 {offsets = [16, 0], sizes = [8, 64], strides = [1, 1]} : vector<128x64xf32> to vector<8x64xf32>
    %45 = vector.extract_strided_slice %40 {offsets = [24, 0], sizes = [8, 64], strides = [1, 1]} : vector<128x64xf32> to vector<8x64xf32>
    %46 = arith.maximumf %44, %45 : vector<8x64xf32>
    %47 = vector.extract_strided_slice %40 {offsets = [8, 0], sizes = [8, 64], strides = [1, 1]} : vector<128x64xf32> to vector<8x64xf32>
    %48 = arith.maximumf %46, %47 : vector<8x64xf32>
    %49 = vector.extract_strided_slice %40 {offsets = [32, 0], sizes = [8, 64], strides = [1, 1]} : vector<128x64xf32> to vector<8x64xf32>
    %50 = vector.extract_strided_slice %40 {offsets = [40, 0], sizes = [8, 64], strides = [1, 1]} : vector<128x64xf32> to vector<8x64xf32>
    %51 = arith.maximumf %49, %50 : vector<8x64xf32>
    %52 = vector.extract_strided_slice %40 {offsets = [24, 0], sizes = [8, 64], strides = [1, 1]} : vector<128x64xf32> to vector<8x64xf32>
    %53 = arith.maximumf %51, %52 : vector<8x64xf32>
    %54 = vector.extract_strided_slice %40 {offsets = [48, 0], sizes = [8, 64], strides = [1, 1]} : vector<128x64xf32> to vector<8x64xf32>
    %55 = vector.extract_strided_slice %40 {offsets = [56, 0], sizes = [8, 64], strides = [1, 1]} : vector<128x64xf32> to vector<8x64xf32>
    %56 = arith.maximumf %54, %55 : vector<8x64xf32>
    %57 = vector.extract_strided_slice %40 {offsets = [40, 0], sizes = [8, 64], strides = [1, 1]} : vector<128x64xf32> to vector<8x64xf32>
    %58 = arith.maximumf %56, %57 : vector<8x64xf32>
    %59 = vector.extract_strided_slice %40 {offsets = [64, 0], sizes = [8, 64], strides = [1, 1]} : vector<128x64xf32> to vector<8x64xf32>
    %60 = vector.extract_strided_slice %40 {offsets = [72, 0], sizes = [8, 64], strides = [1, 1]} : vector<128x64xf32> to vector<8x64xf32>
    %61 = arith.maximumf %59, %60 : vector<8x64xf32>
    %62 = vector.extract_strided_slice %40 {offsets = [56, 0], sizes = [8, 64], strides = [1, 1]} : vector<128x64xf32> to vector<8x64xf32>
    %63 = arith.maximumf %61, %62 : vector<8x64xf32>
    %64 = vector.extract_strided_slice %40 {offsets = [80, 0], sizes = [8, 64], strides = [1, 1]} : vector<128x64xf32> to vector<8x64xf32>
    %65 = vector.extract_strided_slice %40 {offsets = [88, 0], sizes = [8, 64], strides = [1, 1]} : vector<128x64xf32> to vector<8x64xf32>
    %66 = arith.maximumf %64, %65 : vector<8x64xf32>
    %67 = vector.extract_strided_slice %40 {offsets = [72, 0], sizes = [8, 64], strides = [1, 1]} : vector<128x64xf32> to vector<8x64xf32>
    %68 = arith.maximumf %66, %67 : vector<8x64xf32>
    %69 = vector.extract_strided_slice %40 {offsets = [96, 0], sizes = [8, 64], strides = [1, 1]} : vector<128x64xf32> to vector<8x64xf32>
    %70 = vector.extract_strided_slice %40 {offsets = [104, 0], sizes = [8, 64], strides = [1, 1]} : vector<128x64xf32> to vector<8x64xf32>
    %71 = arith.maximumf %69, %70 : vector<8x64xf32>
    %72 = vector.extract_strided_slice %40 {offsets = [88, 0], sizes = [8, 64], strides = [1, 1]} : vector<128x64xf32> to vector<8x64xf32>
    %73 = arith.maximumf %71, %72 : vector<8x64xf32>
    %74 = vector.extract_strided_slice %40 {offsets = [112, 0], sizes = [8, 64], strides = [1, 1]} : vector<128x64xf32> to vector<8x64xf32>
    %75 = vector.extract_strided_slice %40 {offsets = [120, 0], sizes = [8, 64], strides = [1, 1]} : vector<128x64xf32> to vector<8x64xf32>
    %76 = arith.maximumf %74, %75 : vector<8x64xf32>
    %77 = vector.extract_strided_slice %40 {offsets = [104, 0], sizes = [8, 64], strides = [1, 1]} : vector<128x64xf32> to vector<8x64xf32>
    %78 = arith.maximumf %76, %77 : vector<8x64xf32>
    %79 = tpu.concatenate %43, %48, %53, %58, %63, %68, %73, %78 in 0 : vector<8x64xf32>, vector<8x64xf32>, vector<8x64xf32>, vector<8x64xf32>, vector<8x64xf32>, vector<8x64xf32>, vector<8x64xf32>, vector<8x64xf32> -> vector<64x64xf32>
    %c0_20 = arith.constant 0 : index
    %c0_21 = arith.constant 0 : index
    %c0_22 = arith.constant 0 : index
    %80 = vector.load %arg5[%c0_20, %c0_21, %c0_22] : memref<1x64x64xf32, #tpu.memory_space<vmem>>, vector<1x64x64xf32>
    %81 = vector.shape_cast %80 : vector<1x64x64xf32> to vector<64x64xf32>
    %82 = vector.shape_cast %79 : vector<64x64xf32> to vector<1x64x64xf32>
    tpu.vector_store %arg5[%c0_20, %c0_21, %c0_22], %82 {strides = array<i32>} : memref<1x64x64xf32, #tpu.memory_space<vmem>>, vector<1x64x64xf32>,
    return
  }
  func.func @transform_0(%arg0: i32) -> (i32, i32, i32) {
    %c0_i32 = arith.constant 0 : i32
    %c0_i32_0 = arith.constant 0 : i32
    %c0_i32_1 = arith.constant 0 : i32
    return %arg0, %c0_i32, %c0_i32_0 : i32, i32, i32
  }
  func.func @transform_1(%arg0: i32) -> (i32, i32) {
    %c0_i32 = arith.constant 0 : i32
    %c0_i32_0 = arith.constant 0 : i32
    %c0_i32_1 = arith.constant 0 : i32
    return %c0_i32, %c0_i32_0 : i32, i32
  }
  func.func @transform_2(%arg0: i32) -> (i32, i32) {
    %c0_i32 = arith.constant 0 : i32
    %c0_i32_0 = arith.constant 0 : i32
    %c0_i32_1 = arith.constant 0 : i32
    return %c0_i32, %c0_i32_0 : i32, i32
  }
  func.func @transform_3(%arg0: i32) -> (i32, i32) {
    %c0_i32 = arith.constant 0 : i32
    %c0_i32_0 = arith.constant 0 : i32
    %c0_i32_1 = arith.constant 0 : i32
    return %c0_i32, %c0_i32_0 : i32, i32
  }
  func.func @transform_4(%arg0: i32) -> (i32, i32, i32) {
    %c0_i32 = arith.constant 0 : i32
    %c0_i32_0 = arith.constant 0 : i32
    %c0_i32_1 = arith.constant 0 : i32
    return %arg0, %c0_i32, %c0_i32_0 : i32, i32, i32
  }
}

</mosaic_0001>

<bundles_post_ra>
// kernel: tpu_custom_call.1
= control target key start
LH: loop header
LB: loop body
LE: loop exit
PB: predicated region body
PF: predicated region fallthrough
CT: control target
= control target key end

     0   :  { %9 = vsyncpa [#allocation4], 0  ;;  %s2213_s0 = inlined_call_operand.vmem [shape: bf16[2,256,147], index: 0, kind: input, shape index: {}]   ;;  %s2214_s1 = inlined_call_operand.vmem [shape: bf16[147,64], index: 1, kind: input, shape index: {}]   ;;  %s2215_s2 = inlined_call_operand.vmem [shape: f32[1,64], index: 2, kind: input, shape index: {}]   ;;  %s2216_s3 = inlined_call_operand.vmem [shape: f32[1,64], index: 3, kind: input, shape index: {}]   ;;  %s2217_s4 = inlined_call_operand.hbm [shape: f32[2,64,64], index: 4, kind: output, shape index: {}]  }
   0x1   :  { %11 = vsyncpa [#allocation4 + $0x1], 0  ;;  %s1702_s15 = smov 0   ;;  %s1704_s16 = smov 0  }
   0x2   :  { %s1706_s17 = smov 0   ;;  %s1708_s18 = smov 0  }
   0x3 LB: > { %s1723_s19 = sadd.s32 4294967295, %s1672_s18   ;;  %s1321_s20 = sadd.s32 4294967294, %s1672_s18   ;;  %s1672_s18 = sphi %s1708_s18, %s2245_s18   ;;  %s1668_s17 = sphi %s1706_s17, %s2244_s17   ;;  %s1664_s16 = sphi %s1704_s16, %s2243_s16   ;;  %s1660_s15 = sphi %s1702_s15, %s2242_s15  }
   0x4   : > { %s1727_s21 = sadd.s32 1, %s1672_s18   ;;  %s113_s22 = sadd.s32 1, %s1668_s17 }
   0x5   : > { %s110_s23 = ssub.s32 %s1672_s18, %s1727_s21  ;;  %p123_p0 = scmp.ne.s32.totalorder %s1668_s17, %s1664_s16 }
   0x6   : > { %p111_p1 = scmp.eq.s32.totalorder %s110_s23, 0  ;;  %p124_p2 = scmp.eq.s32.totalorder %s1723_s19, 1 }
   0x7   : > { %p129_p3 = scmp.ne.s32.totalorder %s1664_s16, %s1660_s15  ;;  %p130_p4 = scmp.eq.s32.totalorder %s1321_s20, 1 }
   0x8   : > { %s1738_s24 = scalar_select %p111_p1, %s1668_s17, %s113_s22  }
   0x9   : > { %p1740_p5 = por %p124_p2, %p123_p0  ;;  %p1744_p6 = por %p130_p4, %p129_p3 }
   0xa   : > { %p1324_p7 = scmp.ge.s32.totalorder %s1672_s18, 1  ;;  %p165_p8 = scmp.lt.s32.totalorder %s1672_s18, 3 }
   0xc   : > { %p166_p9 = pnand %p1324_p7, %p165_p8 }
   0xd   : > { %p191_p10 = scmp.lt.s32.totalorder (!%p166_p9), %s1723_s19, 1  ;;  %s1555_s22 = sshll.u32 (!%p166_p9), %s1723_s19, 6 }
   0xe   : > { %169 = sbr.rel (%p166_p9) target bundleno = 333 (0x14d), region = 36  ;;  %s1630_s9 = scalar_lea.hbm (!%p166_p9), %s2217_s4, 128 }
  0x13   : > { %v1553_v0 = vld [vmem:[%s2214_s1 + $0x38] sm:$0xff]  ;;  %v247_v1 = vld [vmem:[%s2214_s1 + $0x48] sm:$0x3]  ;;  %vm498_vm0 = vcmask 1040384   ;;  %vm499_vm1 = vcmask 1041408   ;;  %v1552_v3 = vld [vmem:[%s2214_s1 + $0x30] sm:$0xff] }
  0x14   : > { %v429_v2 = vunpack.c.l.b16 %v247_v1  ;;  %505 = vmatpush.bf16.msra.mxu0 %v1553_v0  ;;  %1556 = vmatpush.bf16.msra.mxu2 %v1553_v0  ;;  %v1674_v4 = vmov 65535   ;;  %s192_s7 = scalar_select %p191_p10, %s1723_s19, 1  ;;  %v1551_v9 = vld [vmem:[%s2214_s1 + $0x28] sm:$0xff]  ;;  %v1554_v10 = vld [vmem:[%s2214_s1 + $0x40] sm:$0xff]  ;;  %vm449_vm2 = vcmask 154624   ;;  %v1549_v18 = vld [vmem:[%s2214_s1 + $0x18] sm:$0xff] }
  0x15   : > { %v500_v5 = vsel %vm498_vm0, 4294967295, %v1674_v4  ;;  %v1550_v15 = vld [vmem:[%s2214_s1 + $0x20] sm:$0xff]  ;;  %v1548_v19 = vld [vmem:[%s2214_s1 + $0x10] sm:$0xff]  ;;  %v1547_v20 = vld [vmem:[%s2214_s1 + $0x8] sm:$0xff]  ;;  %vm787_vm3 = vcmask 523264   ;;  %s1255_s19 = scalar_lea.hbm %s2217_s4, %s1555_s22 }
  0x16   : > { %v439_v6 = vpack.c.b16 %v429_v2, %v429_v2  ;;  %v501_v7 = vsel %vm499_vm1, %v500_v5, 0  ;;  %s1513_s8 = sshll.u32 %s192_s7, 8  ;;  %v1546_v26 = vld [vmem:[%s2214_s1] sm:$0xff]  ;;  %s1258_s29 = sshll.u32 %s1255_s19, 4  ;;  %s1259_s29 = int_to_ptr.hbm [resolvable:$true] %s1258_s29 }
  0x17   : > { %s1768_s13 = scalar_lea.vmem %s2213_s0, %s1513_s8  ;;  %s1624_s5 = sshra.s32 %s1259_s29, 4  ;;  %s1625_s5 = int_to_ptr.hbm [resolvable:$true] %s1624_s5 }
  0x18   : > { %v503_v8 = vand.u32 %v501_v7, %v439_v6  ;;  %506 = vmatpush.bf16.msra.mxu0 %v1552_v3  ;;  %1557 = vmatpush.bf16.msra.mxu2 %v1552_v3  ;;  %v1514_v11 = vld [vmem:[%s1768_s13 + $0x4] sm:$0xf]  ;;  %v1332_v12 = vld [vmem:[%s1768_s13 + $0x8] sm:$0xf0]  ;;  %v1532_v13 = vld [vmem:[%s1768_s13 + $0x94] sm:$0xf]  ;;  %p1631_p0 = scmp.lt.s32.totalorder %s1625_s5, %s2217_s4 }
  0x19   : > { %v1335_v14 = vor.u32 %v1514_v11, %v1332_v12  ;;  %v1404_v16 = vld [vmem:[%s1768_s13 + $0x98] sm:$0xf0]  ;;  %v1516_v21 = vld [vmem:[%s1768_s13 + $0x14] sm:$0xf]  ;;  %v1534_v23 = vld [vmem:[%s1768_s13 + $0xa4] sm:$0xf] }
  0x1a   : > { %600 = vmatpush.bf16.msra.mxu1 %v503_v8  ;;  %1564 = vmatpush.bf16.msra.mxu3 %v503_v8  ;;  %v1407_v17 = vor.u32 %v1532_v13, %v1404_v16  ;;  %v1340_v22 = vld [vmem:[%s1768_s13 + $0x18] sm:$0xf0]  ;;  %v1412_v24 = vld [vmem:[%s1768_s13 + $0xa8] sm:$0xf0]  ;;  %v1330_v27 = vld [vmem:[%s1768_s13] sm:$0xf] }
  0x1b   : > { %v1343_v25 = vor.u32 %v1516_v21, %v1340_v22  ;;  %v1515_v28 = vld [vmem:[%s1768_s13 + $0x4] sm:$0xf0]  ;;  %v1394_v29 = vld [vmem:[%s1768_s13 + $0x80] sm:$0xf]  ;;  %v1415_v31 = vor.u32 %v1534_v23, %v1412_v24  ;;  %v1518_v34 = vld [vmem:[%s1768_s13 + $0x24] sm:$0xf] }
  0x1c   : > { %507 = vmatpush.bf16.msra.mxu0 %v1551_v9  ;;  %1558 = vmatpush.bf16.msra.mxu2 %v1551_v9  ;;  %v1531_v30 = vld [vmem:[%s1768_s13 + $0x84] sm:$0xf0]  ;;  %v1331_v32 = vor.u32 %v1515_v28, %v1330_v27  ;;  %v1348_v35 = vld [vmem:[%s1768_s13 + $0x28] sm:$0xf0]  ;;  %v1536_v36 = vld [vmem:[%s1768_s13 + $0xb4] sm:$0xf] }
  0x1d   : > { %v1395_v33 = vor.u32 %v1531_v30, %v1394_v29  ;;  %v1420_v37 = vld [vmem:[%s1768_s13 + $0xb8] sm:$0xf0]  ;;  %v1351_v38 = vor.u32 %v1518_v34, %v1348_v35  ;;  %v1338_v39 = vld [vmem:[%s1768_s13 + $0x10] sm:$0xf]  ;;  %v1517_v40 = vld [vmem:[%s1768_s13 + $0x14] sm:$0xf0] }
  0x1e   : > { %601 = vmatpush.bf16.msra.mxu1 %v1554_v10  ;;  %1565 = vmatpush.bf16.msra.mxu3 %v1554_v10  ;;  %v1402_v41 = vld [vmem:[%s1768_s13 + $0x90] sm:$0xf]  ;;  %v1533_v42 = vld [vmem:[%s1768_s13 + $0x94] sm:$0xf0]  ;;  %v1423_v43 = vor.u32 %v1536_v36, %v1420_v37  ;;  %v1339_v44 = vor.u32 %v1517_v40, %v1338_v39  ;;  %v1520_v46 = vld [vmem:[%s1768_s13 + $0x34] sm:$0xf] }
  0x1f   : > { %v1403_v45 = vor.u32 %v1533_v42, %v1402_v41  ;;  %v1356_v47 = vld [vmem:[%s1768_s13 + $0x38] sm:$0xf0]  ;;  %v1538_v48 = vld [vmem:[%s1768_s13 + $0xc4] sm:$0xf]  ;;  %v1428_v49 = vld [vmem:[%s1768_s13 + $0xc8] sm:$0xf0] }
  0x20   : > { %508 = vmatpush.bf16.msra.mxu0 %v1550_v15  ;;  %1559 = vmatpush.bf16.msra.mxu2 %v1550_v15  ;;  %v1359_v50 = vor.u32 %v1520_v46, %v1356_v47  ;;  %v1346_v51 = vld [vmem:[%s1768_s13 + $0x20] sm:$0xf]  ;;  %v1519_v52 = vld [vmem:[%s1768_s13 + $0x24] sm:$0xf0]  ;;  %v1431_v55 = vor.u32 %v1538_v48, %v1428_v49  ;;  %v1522_v58 = vld [vmem:[%s1768_s13 + $0x44] sm:$0xf] }
  0x21   : > { %1492 = vmatmul.msk.bf16.vlgmr.msra.gmra.mxu1 %vm449_vm2, %v1335_v14  ;;  %1501 = vmatmul.msk.bf16.vlgmr.msra.gmra.mxu3 %vm449_vm2, %v1407_v17  ;;  %v1410_v53 = vld [vmem:[%s1768_s13 + $0xa0] sm:$0xf]  ;;  %v1535_v54 = vld [vmem:[%s1768_s13 + $0xa4] sm:$0xf0]  ;;  %v1347_v56 = vor.u32 %v1519_v52, %v1346_v51  ;;  %v1364_v59 = vld [vmem:[%s1768_s13 + $0x48] sm:$0xf0] }
  0x22   : > { %v1411_v57 = vor.u32 %v1535_v54, %v1410_v53  ;;  %v1540_v60 = vld [vmem:[%s1768_s13 + $0xd4] sm:$0xf]  ;;  %v1436_v61 = vld [vmem:[%s1768_s13 + $0xd8] sm:$0xf0]  ;;  %v1367_v62 = vor.u32 %v1522_v58, %v1364_v59  ;;  %v1354_v63 = vld [vmem:[%s1768_s13 + $0x30] sm:$0xf] }
  0x23   : > { %v1521_v0 = vld [vmem:[%s1768_s13 + $0x34] sm:$0xf0]  ;;  %v1418_v1 = vld [vmem:[%s1768_s13 + $0xb0] sm:$0xf]  ;;  %v1439_v3 = vor.u32 %v1540_v60, %v1436_v61  ;;  %v1524_v6 = vld [vmem:[%s1768_s13 + $0x54] sm:$0xf] }
  0x24   : > { %509 = vmatpush.bf16.msra.mxu0 %v1549_v18  ;;  %1560 = vmatpush.bf16.msra.mxu2 %v1549_v18  ;;  %v1537_v2 = vld [vmem:[%s1768_s13 + $0xb4] sm:$0xf0]  ;;  %v1355_v4 = vor.u32 %v1521_v0, %v1354_v63  ;;  %v1372_v7 = vld [vmem:[%s1768_s13 + $0x58] sm:$0xf0]  ;;  %v1542_v8 = vld [vmem:[%s1768_s13 + $0xe4] sm:$0xf] }
  0x25   : > { %v1419_v5 = vor.u32 %v1537_v2, %v1418_v1  ;;  %v1444_v9 = vld [vmem:[%s1768_s13 + $0xe8] sm:$0xf0]  ;;  %v1375_v10 = vor.u32 %v1524_v6, %v1372_v7  ;;  %v1362_v11 = vld [vmem:[%s1768_s13 + $0x40] sm:$0xf]  ;;  %v1523_v12 = vld [vmem:[%s1768_s13 + $0x44] sm:$0xf0] }
  0x26   : > { %v1426_v13 = vld [vmem:[%s1768_s13 + $0xc0] sm:$0xf]  ;;  %v1539_v14 = vld [vmem:[%s1768_s13 + $0xc4] sm:$0xf0]  ;;  %v1447_v15 = vor.u32 %v1542_v8, %v1444_v9  ;;  %v1363_v16 = vor.u32 %v1523_v12, %v1362_v11  ;;  %v1526_v18 = vld [vmem:[%s1768_s13 + $0x64] sm:$0xf] }
  0x27   : > { %v1427_v17 = vor.u32 %v1539_v14, %v1426_v13  ;;  %v1452_v21 = vld [vmem:[%s1768_s13 + $0xf8] sm:$0xf0]  ;;  %v1370_v23 = vld [vmem:[%s1768_s13 + $0x50] sm:$0xf]  ;;  %v1525_v24 = vld [vmem:[%s1768_s13 + $0x54] sm:$0xf0] }
  0x28   : > { %510 = vmatpush.bf16.msra.mxu0 %v1548_v19  ;;  %1561 = vmatpush.bf16.msra.mxu2 %v1548_v19  ;;  %v1380_v19 = vld [vmem:[%s1768_s13 + $0x68] sm:$0xf0]  ;;  %v1371_v28 = vor.u32 %v1525_v24, %v1370_v23  ;;  %v1528_v30 = vld [vmem:[%s1768_s13 + $0x74] sm:$0xf]  ;;  %v1527_v34 = vld [vmem:[%s1768_s13 + $0x64] sm:$0xf0] }
  0x29   : > { %v1383_v22 = vor.u32 %v1526_v18, %v1380_v19  ;;  %v1442_v35 = vld [vmem:[%s1768_s13 + $0xe0] sm:$0xf]  ;;  %v1543_v36 = vld [vmem:[%s1768_s13 + $0xe4] sm:$0xf0]  ;;  %v1530_v39 = vld [vmem:[%s1768_s13 + $0x84] sm:$0xf] }
  0x2a   : > { %v1396_v40 = vld [vmem:[%s1768_s13 + $0x88] sm:$0xf0]  ;;  %v1386_v42 = vld [vmem:[%s1768_s13 + $0x70] sm:$0xf]  ;;  %v1545_v46 = vld [vmem:[%s1768_s13 + $0xf4] sm:$0xf0] }
  0x2b   : > { %v1399_v41 = vor.u32 %v1530_v39, %v1396_v40  ;;  %v1871_v52 = vld [vmem:[%s2215_s2] ss:$0 sm:$0xff]  ;;  %s1626_s6 = scalar_lea.hbm %s1625_s5, 64 }
  0x2c   : > { %511 = vmatpush.bf16.msra.mxu0 %v1547_v20  ;;  %1562 = vmatpush.bf16.msra.mxu2 %v1547_v20  ;;  %v1544_v20 = vld [vmem:[%s1768_s13 + $0xf4] sm:$0xf]  ;;  %p1627_p11 = scmp.ne.s32.totalorder %s1625_s5, %s1626_s6  ;;  %p1632_p1 = scmp.lt.s32.totalorder %s1630_s9, %s1626_s6 }
  0x2d   : > { %v1455_v27 = vor.u32 %v1544_v20, %v1452_v21 }
  0x2e   : > { %p1628_p12 = pnand %p1627_p11, %p1740_p5  ;;  %p1633_p2 = por %p1632_p1, %p1631_p0 }
  0x30   : > { %512 = vmatpush.bf16.msra.mxu0 %v1546_v26  ;;  %1563 = vmatpush.bf16.msra.mxu2 %v1546_v26  ;;  %v1541_v26 = vld [vmem:[%s1768_s13 + $0xd4] sm:$0xf0]  ;;  %p1629_p13 = pneg %p1628_p12 }
  0x31   : > { %1493 = vmatmul.msk.bf16.gmra.mxu1 %vm449_vm2, %v1343_v25  ;;  %1502 = vmatmul.msk.bf16.gmra.mxu3 %vm449_vm2, %v1415_v31  ;;  %v1434_v25 = vld [vmem:[%s1768_s13 + $0xd0] sm:$0xf]  ;;  %v1388_v31 = vld [vmem:[%s1768_s13 + $0x78] sm:$0xf0] }
  0x32   : > { %v1435_v29 = vor.u32 %v1541_v26, %v1434_v25  ;;  %p1634_p3 = pnand %p1633_p2, %p1629_p13 }
  0x33   : > { %513 = vmatmul.bf16.vlgmr.msra.gmra.mxu0 %v1331_v32  ;;  %553 = vmatmul.bf16.vlgmr.msra.gmra.mxu2 %v1395_v33  ;;  %v1391_v32 = vor.u32 %v1528_v30, %v1388_v31  ;;  %v1378_v33 = vld [vmem:[%s1768_s13 + $0x60] sm:$0xf] }
  0x34   : > { %v1379_v37 = vor.u32 %v1527_v34, %v1378_v33 }
  0x41   : > { %1494 = vmatmul.msk.bf16.gmra.mxu1 %vm449_vm2, %v1351_v38  ;;  %1503 = vmatmul.msk.bf16.gmra.mxu3 %vm449_vm2, %v1423_v43  ;;  %v1443_v38 = vor.u32 %v1543_v36, %v1442_v35  ;;  %v1529_v43 = vld [vmem:[%s1768_s13 + $0x74] sm:$0xf0] }
  0x42   : > { %v1387_v47 = vor.u32 %v1529_v43, %v1386_v42 }
  0x43   : > { %518 = vmatmul.bf16.gmra.mxu0 %v1339_v44  ;;  %558 = vmatmul.bf16.gmra.mxu2 %v1403_v45  ;;  %v1450_v45 = vld [vmem:[%s1768_s13 + $0xf0] sm:$0xf]  ;;  %s188_s13 = sand.u32 1, %s1664_s16  }
  0x44   : > { %v1451_v48 = vor.u32 %v1545_v46, %v1450_v45  ;;  %s1325_s14 = sshll.u32 %s188_s13, 6  ;;  %s1244_s30 = scalar_lea.sflag [#allocation4], %s188_s13 }
  0x45   : > { %s1934_s20 = scalar_lea.vmem [#allocation3], %s1325_s14 }
  0x46   : > { %s1256_s28 = sshll.u32 %s1934_s20, 4  ;;  %s1257_s28 = int_to_ptr.vmem [resolvable:$true] %s1256_s28 }
  0x51   : > { %1495 = vmatmul.msk.bf16.gmra.mxu1 %vm449_vm2, %v1359_v50  ;;  %1504 = vmatmul.msk.bf16.gmra.mxu3 %vm449_vm2, %v1431_v55  ;;  %v1876_v55 = vld [vmem:[%s2216_s3] ss:$0 sm:$0xff] }
  0x53   : > { %523 = vmatmul.bf16.gmra.mxu0 %v1347_v56  ;;  %563 = vmatmul.bf16.gmra.mxu2 %v1411_v57 }
  0x61   : > { %1496 = vmatmul.msk.bf16.gmra.mxu1 %vm449_vm2, %v1367_v62  ;;  %1505 = vmatmul.msk.bf16.gmra.mxu3 %vm449_vm2, %v1439_v3 }
  0x63   : > { %528 = vmatmul.bf16.gmra.mxu0 %v1355_v4  ;;  %568 = vmatmul.bf16.gmra.mxu2 %v1419_v5 }
  0x71   : > { %1497 = vmatmul.msk.bf16.gmra.mxu1 %vm449_vm2, %v1375_v10  ;;  %1506 = vmatmul.msk.bf16.gmra.mxu3 %vm449_vm2, %v1447_v15 }
  0x73   : > { %533 = vmatmul.bf16.gmra.mxu0 %v1363_v16  ;;  %573 = vmatmul.bf16.gmra.mxu2 %v1427_v17  ;;  %v963_v17 = vlaneseq }
  0x75   : > { %v1895_v24 = vshrl.u32 %v963_v17, 7 }
  0x77   : > { %v965_v30 = vadd.s32 8, %v1895_v24  ;;  %v984_v34 = vand.u32 7, %v1895_v24 }
  0x79   : > { %vm1906_vm4 = vcmp.eq.s32.totalorder %v984_v34, 0 }
  0x81   : > { %1498 = vmatmul.msk.bf16.gmra.mxu1 %vm449_vm2, %v1383_v22  ;;  %1507 = vmatmul.msk.bf16.gmra.mxu3 %vm449_vm2, %v1455_v27 }
  0x83   : > { %538 = vmatmul.bf16.gmra.mxu0 %v1371_v28  ;;  %578 = vmatmul.bf16.gmra.mxu2 %v1435_v29 }
  0x91   : > { %1499 = vmatmul.msk.bf16.gmra.mxu1 %vm449_vm2, %v1391_v32 }
  0x93   : > { %543 = vmatmul.bf16.gmra.mxu0 %v1379_v37  ;;  %583 = vmatmul.bf16.gmra.mxu2 %v1443_v38  ;;  %v991_v37 = vand.u32 7, %v965_v30 }
  0x95   : > { %vm1173_vm5 = vcmp.eq.s32.totalorder %v991_v37, 0 }
  0x9e   : > { %v603_v44 = vpop.f32.mrf.mxu1 }
  0xa1   : > { %1500 = vmatmul.msk.bf16.gmra.mxu1 %vm449_vm2, %v1399_v41 }
  0xa3   : > { %548 = vmatmul.bf16.gmra.mxu0 %v1387_v47  ;;  %588 = vmatmul.bf16.gmra.mxu2 %v1451_v48 }
  0xa4   : > { %v648_v51 = vpop.f32.mrf.mxu3 }
  0xa6   : > { %v605_v49 = vpop.f32.mrf.mxu1 }
  0xac   : > { %v650_v61 = vpop.f32.mrf.mxu3 }
  0xae   : > { %v608_v50 = vpop.f32.mrf.mxu1 }
  0xb0   : > { %v514_v53 = vpop.f32.mrf.mxu0 }
  0xb1   : > { %v604_v54 = vadd.f32 %v603_v44, %v514_v53 }
  0xb3   : > { %v687_v56 = vmul.f32 %v1871_v52, %v604_v54 }
  0xb4   : > { %v653_v7 = vpop.f32.mrf.mxu3 }
  0xb5   : > { %v723_v57 = vadd.f32 %v1876_v55, %v687_v56 }
  0xb6   : > { %v610_v58 = vpop.f32.mrf.mxu1  ;;  %v1880_v60 = vpop.f32.mrf.mxu2 }
  0xb7   : > { %v755_v59 = vmax.f32 %v723_v57, 0.0 }
  0xb8   : > { %v516_v62 = vpop.f32.mrf.mxu0 }
  0xb9   : > { %788 = vst.msk [vmem:[#allocation2] sm:$0xff] %vm787_vm3, %v755_v59  ;;  %v606_v63 = vadd.f32 %v605_v49, %v516_v62 }
  0xbb   : > { %v688_v0 = vmul.f32 %v1871_v52, %v606_v63 }
  0xbc   : > { %v655_v19 = vpop.f32.mrf.mxu3 }
  0xbd   : > { %v724_v1 = vadd.f32 %v1876_v55, %v688_v0 }
  0xbe   : > { %v613_v2 = vpop.f32.mrf.mxu1  ;;  %v1885_v4 = vpop.f32.mrf.mxu2 }
  0xbf   : > { %v756_v3 = vmax.f32 %v724_v1, 0.0 }
  0xc0   : > { %v519_v5 = vpop.f32.mrf.mxu0 }
  0xc1   : > { %789 = vst.msk [vmem:[#allocation2 + $0x8] sm:$0xff] %vm787_vm3, %v756_v3  ;;  %v609_v6 = vadd.f32 %v608_v50, %v519_v5 }
  0xc3   : > { %v689_v8 = vmul.f32 %v1871_v52, %v609_v6 }
  0xc4   : > { %v658_v40 = vpop.f32.mrf.mxu3 }
  0xc5   : > { %v725_v9 = vadd.f32 %v1876_v55, %v689_v8 }
  0xc6   : > { %v615_v10 = vpop.f32.mrf.mxu1  ;;  %v559_v12 = vpop.f32.mrf.mxu2 }
  0xc7   : > { %v757_v11 = vmax.f32 %v725_v9, 0.0  ;;  %v649_v13 = vadd.f32 %v648_v51, %v559_v12 }
  0xc8   : > { %v521_v14 = vpop.f32.mrf.mxu0  ;;  %v852_v27 = vld [vmem:[#allocation2 + $0x1] ss:$2 sm:$0xff]  ;;  %v820_v42 = vld [vmem:[#allocation2] ss:$2 sm:$0xff] }
  0xc9   : > { %790 = vst.msk [vmem:[#allocation2 + $0x10] sm:$0xff] %vm787_vm3, %v757_v11  ;;  %v611_v15 = vadd.f32 %v610_v58, %v521_v14  ;;  %v705_v16 = vmul.f32 %v1871_v52, %v649_v13  ;;  %v915_v33 = vrot.slane %v852_v27, 7  ;;  %v883_v57 = vmax.f32 %v820_v42, %v852_v27 }
  0xcb   : > { %v690_v18 = vmul.f32 %v1871_v52, %v611_v15  ;;  %v741_v20 = vadd.f32 %v1876_v55, %v705_v16  ;;  %v962_v43 = vsel %vm498_vm0, 0.0, %v915_v33 }
  0xcc   : > { %v1188_v54 = vsel %vm1906_vm4, 0.0, %v962_v43  ;;  %v660_v9 = vpop.f32.mrf.mxu3 }
  0xcd   : > { %v726_v21 = vadd.f32 %v1876_v55, %v690_v18  ;;  %v773_v23 = vmax.f32 %v741_v20, 0.0  ;;  %v1204_v0 = vmax.f32 %v883_v57, %v1188_v54 }
  0xce   : > { %v618_v22 = vpop.f32.mrf.mxu1  ;;  %v561_v26 = vpop.f32.mrf.mxu2 }
  0xcf   : > { %v758_v25 = vmax.f32 %v726_v21, 0.0  ;;  %806 = vst.msk [vmem:[#allocation2 + $0x90] sm:$0xff] %vm787_vm3, %v773_v23  ;;  %v651_v28 = vadd.f32 %v650_v61, %v561_v26 }
  0xd0   : > { %v524_v29 = vpop.f32.mrf.mxu0 }
  0xd1   : > { %791 = vst.msk [vmem:[#allocation2 + $0x18] sm:$0xff] %vm787_vm3, %v758_v25  ;;  %v614_v31 = vadd.f32 %v613_v2, %v524_v29  ;;  %v706_v32 = vmul.f32 %v1871_v52, %v651_v28 }
  0xd3   : > { %v691_v35 = vmul.f32 %v1871_v52, %v614_v31  ;;  %v742_v36 = vadd.f32 %v1876_v55, %v706_v32  ;;  %v966_v32 = vadd.s32 16, %v1895_v24 }
  0xd4   : > { %v663_v25 = vpop.f32.mrf.mxu3 }
  0xd5   : > { %v727_v38 = vadd.f32 %v1876_v55, %v691_v35  ;;  %v774_v41 = vmax.f32 %v742_v36, 0.0  ;;  %v998_v42 = vand.u32 7, %v966_v32 }
  0xd6   : > { %v620_v39 = vpop.f32.mrf.mxu1  ;;  %v564_v46 = vpop.f32.mrf.mxu2 }
  0xd7   : > { %v759_v45 = vmax.f32 %v727_v38, 0.0  ;;  %807 = vst.msk [vmem:[#allocation2 + $0x98] sm:$0xff] %vm787_vm3, %v774_v41  ;;  %v654_v49 = vadd.f32 %v653_v7, %v564_v46  ;;  %v967_v38 = vadd.s32 24, %v1895_v24  ;;  %vm1958_vm6 = vcmp.eq.s32.totalorder %v998_v42, 0 }
  0xd8   : > { %v822_v47 = vld [vmem:[#allocation2 + $0x10] ss:$2 sm:$0xff]  ;;  %v1910_v48 = vld [vmem:[#allocation2 + $0x11] ss:$2 sm:$0xff]  ;;  %v526_v50 = vpop.f32.mrf.mxu0 }
  0xd9   : > { %v916_v51 = vrot.slane %v1910_v48, 7  ;;  %792 = vst.msk [vmem:[#allocation2 + $0x20] sm:$0xff] %vm787_vm3, %v759_v45  ;;  %v616_v53 = vadd.f32 %v615_v10, %v526_v50  ;;  %v707_v56 = vmul.f32 %v1871_v52, %v654_v49  ;;  %v884_v58 = vmax.f32 %v822_v47, %v1910_v48 }
  0xda   : > { %v1005_v46 = vand.u32 7, %v967_v38 }
  0xdb   : > { %v917_v59 = vsel %vm498_vm0, %v915_v33, %v916_v51  ;;  %v692_v61 = vmul.f32 %v1871_v52, %v616_v53  ;;  %v743_v63 = vadd.f32 %v1876_v55, %v707_v56 }
  0xdc   : > { %v1189_v62 = vsel %vm1173_vm5, 0.0, %v917_v59  ;;  %v665_v44 = vpop.f32.mrf.mxu3  ;;  %vm1175_vm7 = vcmp.eq.s32.totalorder %v1005_v46, 0 }
  0xdd   : > { %v1927_v1 = vmax.f32 %v884_v58, %v1189_v62  ;;  %v728_v2 = vadd.f32 %v1876_v55, %v692_v61  ;;  %v775_v5 = vmax.f32 %v743_v63, 0.0 }
  0xde   : > { %v623_v3 = vpop.f32.mrf.mxu1  ;;  %v566_v8 = vpop.f32.mrf.mxu2 }
  0xdf   : > { %v1220_v6 = vmax.f32 %v1204_v0, %v1927_v1  ;;  %v760_v7 = vmax.f32 %v728_v2, 0.0  ;;  %808 = vst.msk [vmem:[#allocation2 + $0xa0] sm:$0xff] %vm787_vm3, %v775_v5  ;;  %v656_v10 = vadd.f32 %v655_v19, %v566_v8 }
  0xe0   : > { %v529_v11 = vpop.f32.mrf.mxu0 }
  0xe1   : > { %793 = vst.msk [vmem:[#allocation2 + $0x28] sm:$0xff] %vm787_vm3, %v760_v7  ;;  %v619_v12 = vadd.f32 %v618_v22, %v529_v11  ;;  %v708_v13 = vmul.f32 %v1871_v52, %v656_v10 }
  0xe2   : > { %1235 = vst.msk [vmem:[%s1934_s20] sm:$0xff] %vm787_vm3, %v1220_v6 }
  0xe3   : > { %v693_v14 = vmul.f32 %v1871_v52, %v619_v12  ;;  %v744_v15 = vadd.f32 %v1876_v55, %v708_v13 }
  0xe5   : > { %v729_v16 = vadd.f32 %v1876_v55, %v693_v14  ;;  %v776_v18 = vmax.f32 %v744_v15, 0.0  ;;  %v668_v14 = vpop.f32.mrf.mxu3 }
  0xe6   : > { %v625_v17 = vpop.f32.mrf.mxu1  ;;  %v569_v20 = vpop.f32.mrf.mxu2 }
  0xe7   : > { %v761_v19 = vmax.f32 %v729_v16, 0.0  ;;  %809 = vst.msk [vmem:[#allocation2 + $0xa8] sm:$0xff] %vm787_vm3, %v776_v18  ;;  %v659_v21 = vadd.f32 %v658_v40, %v569_v20 }
  0xe8   : > { %v531_v22 = vpop.f32.mrf.mxu0  ;;  %v856_v35 = vld [vmem:[#allocation2 + $0x21] ss:$2 sm:$0xff]  ;;  %v824_v53 = vld [vmem:[#allocation2 + $0x20] ss:$2 sm:$0xff] }
  0xe9   : > { %794 = vst.msk [vmem:[#allocation2 + $0x30] sm:$0xff] %vm787_vm3, %v761_v19  ;;  %v621_v23 = vadd.f32 %v620_v39, %v531_v22  ;;  %v709_v26 = vmul.f32 %v1871_v52, %v659_v21  ;;  %v918_v41 = vrot.slane %v856_v35, 7 }
  0xeb   : > { %v694_v27 = vmul.f32 %v1871_v52, %v621_v23  ;;  %v745_v28 = vadd.f32 %v1876_v55, %v709_v26  ;;  %v919_v54 = vsel %vm498_vm0, %v916_v51, %v918_v41 }
  0xec   : > { %v1190_v51 = vsel %vm1958_vm6, 0.0, %v919_v54 }
  0xed   : > { %v730_v29 = vadd.f32 %v1876_v55, %v694_v27  ;;  %v777_v31 = vmax.f32 %v745_v28, 0.0 }
  0xee   : > { %v628_v30 = vpop.f32.mrf.mxu1  ;;  %v571_v34 = vpop.f32.mrf.mxu2 }
  0xef   : > { %v762_v33 = vmax.f32 %v730_v29, 0.0  ;;  %810 = vst.msk [vmem:[#allocation2 + $0xb0] sm:$0xff] %vm787_vm3, %v777_v31  ;;  %v661_v36 = vadd.f32 %v660_v9, %v571_v34 }
  0xf0   : > { %v534_v37 = vpop.f32.mrf.mxu0 }
  0xf1   : > { %795 = vst.msk [vmem:[#allocation2 + $0x38] sm:$0xff] %vm787_vm3, %v762_v33  ;;  %v624_v39 = vadd.f32 %v623_v3, %v534_v37  ;;  %v710_v40 = vmul.f32 %v1871_v52, %v661_v36  ;;  %v885_v3 = vmax.f32 %v824_v53, %v856_v35  ;;  %v670_v33 = vpop.f32.mrf.mxu3  ;;  %v975_v53 = vadd.s32 88, %v1895_v24 }
  0xf3   : > { %v695_v43 = vmul.f32 %v1871_v52, %v624_v39  ;;  %v746_v45 = vadd.f32 %v1876_v55, %v710_v40  ;;  %v1206_v10 = vmax.f32 %v885_v3, %v1190_v51  ;;  %v1061_v3 = vand.u32 7, %v975_v53 }
  0xf5   : > { %v731_v47 = vadd.f32 %v1876_v55, %v695_v43  ;;  %v778_v50 = vmax.f32 %v746_v45, 0.0  ;;  %vm2058_vm11 = vcmp.eq.s32.totalorder %v1061_v3, 0 }
  0xf6   : > { %v630_v49 = vpop.f32.mrf.mxu1  ;;  %v574_v58 = vpop.f32.mrf.mxu2 }
  0xf7   : > { %v763_v57 = vmax.f32 %v731_v47, 0.0  ;;  %811 = vst.msk [vmem:[#allocation2 + $0xb8] sm:$0xff] %vm787_vm3, %v778_v50  ;;  %v664_v62 = vadd.f32 %v663_v25, %v574_v58  ;;  %v969_v47 = vadd.s32 40, %v1895_v24 }
  0xf8   : > { %v826_v59 = vld [vmem:[#allocation2 + $0x30] ss:$2 sm:$0xff]  ;;  %v1962_v61 = vld [vmem:[#allocation2 + $0x31] ss:$2 sm:$0xff]  ;;  %v536_v63 = vpop.f32.mrf.mxu0 }
  0xf9   : > { %v920_v0 = vrot.slane %v1962_v61, 7  ;;  %796 = vst.msk [vmem:[#allocation2 + $0x40] sm:$0xff] %vm787_vm3, %v763_v57  ;;  %v626_v48 = vadd.f32 %v625_v17, %v536_v63  ;;  %v711_v2 = vmul.f32 %v1871_v52, %v664_v62  ;;  %v886_v5 = vmax.f32 %v826_v59, %v1962_v61 }
  0xfa   : > { %v976_v62 = vadd.s32 96, %v1895_v24  ;;  %v1019_v63 = vand.u32 7, %v969_v47 }
  0xfb   : > { %v921_v6 = vsel %vm498_vm0, %v918_v41, %v920_v0  ;;  %v696_v7 = vmul.f32 %v1871_v52, %v626_v48  ;;  %v747_v9 = vadd.f32 %v1876_v55, %v711_v2  ;;  %v968_v41 = vadd.s32 32, %v1895_v24 }
  0xfc   : > { %v1191_v8 = vsel %vm1175_vm7, 0.0, %v921_v6  ;;  %v1068_v61 = vand.u32 7, %v976_v62  ;;  %vm2025_vm9 = vcmp.eq.s32.totalorder %v1019_v63, 0 }
  0xfd   : > { %v1976_v11 = vmax.f32 %v886_v5, %v1191_v8  ;;  %v732_v12 = vadd.f32 %v1876_v55, %v696_v7  ;;  %v779_v15 = vmax.f32 %v747_v9, 0.0  ;;  %v1012_v57 = vand.u32 7, %v968_v41 }
  0xfe   : > { %v633_v13 = vpop.f32.mrf.mxu1  ;;  %v576_v18 = vpop.f32.mrf.mxu2  ;;  %v2009_v2 = vld [vmem:[#allocation2 + $0xb1] ss:$2 sm:$0xff]  ;;  %vm2050_vm10 = vcmp.eq.s32.totalorder %v1068_v61, 0  ;;  %v970_v41 = vadd.s32 48, %v1895_v24 }
  0xff   : > { %v1221_v16 = vmax.f32 %v1206_v10, %v1976_v11  ;;  %v764_v17 = vmax.f32 %v732_v12, 0.0  ;;  %812 = vst.msk [vmem:[#allocation2 + $0xc0] sm:$0xff] %vm787_vm3, %v779_v15  ;;  %v666_v19 = vadd.f32 %v665_v44, %v576_v18  ;;  %vm2014_vm8 = vcmp.eq.s32.totalorder %v1012_v57, 0 }
 0x100   : > { %v539_v20 = vpop.f32.mrf.mxu0  ;;  %v977_v15 = vadd.s32 104, %v1895_v24 }
 0x101   : > { %v1222_v21 = vmax.f32 %v1221_v16, %v1927_v1  ;;  %797 = vst.msk [vmem:[#allocation2 + $0x48] sm:$0xff] %vm787_vm3, %v764_v17  ;;  %v629_v22 = vadd.f32 %v628_v30, %v539_v20  ;;  %v712_v23 = vmul.f32 %v1871_v52, %v666_v19  ;;  %v2030_v20 = vld [vmem:[#allocation2 + $0xa1] ss:$2 sm:$0xff] }
 0x103   : > { %v697_v25 = vmul.f32 %v1871_v52, %v629_v22  ;;  %1236 = vst.msk [vmem:[%s1934_s20 + $0x8] sm:$0xff] %vm787_vm3, %v1222_v21  ;;  %v748_v26 = vadd.f32 %v1876_v55, %v712_v23  ;;  %v936_v21 = vrot.slane %v2009_v2, 7 }
 0x105   : > { %v733_v27 = vadd.f32 %v1876_v55, %v697_v25  ;;  %v780_v29 = vmax.f32 %v748_v26, 0.0 }
 0x106   : > { %v635_v28 = vpop.f32.mrf.mxu1  ;;  %v579_v32 = vpop.f32.mrf.mxu2 }
 0x107   : > { %v765_v31 = vmax.f32 %v733_v27, 0.0  ;;  %813 = vst.msk [vmem:[#allocation2 + $0xc8] sm:$0xff] %vm787_vm3, %v780_v29  ;;  %v669_v1 = vadd.f32 %v668_v14, %v579_v32 }
 0x108   : > { %v541_v34 = vpop.f32.mrf.mxu0  ;;  %v860_v44 = vld [vmem:[#allocation2 + $0x41] ss:$2 sm:$0xff]  ;;  %v828_v6 = vld [vmem:[#allocation2 + $0x40] ss:$2 sm:$0xff] }
 0x109   : > { %798 = vst.msk [vmem:[#allocation2 + $0x50] sm:$0xff] %vm787_vm3, %v765_v31  ;;  %v631_v30 = vadd.f32 %v630_v49, %v541_v34  ;;  %v713_v35 = vmul.f32 %v1871_v52, %v669_v1  ;;  %v673_v49 = vpop.f32.mrf.mxu3  ;;  %v922_v56 = vrot.slane %v860_v44, 7  ;;  %v887_v26 = vmax.f32 %v828_v6, %v860_v44 }
 0x10a   : > { %v934_v34 = vrot.slane %v2030_v20, 7 }
 0x10b   : > { %v698_v36 = vmul.f32 %v1871_v52, %v631_v30  ;;  %v749_v37 = vadd.f32 %v1876_v55, %v713_v35  ;;  %v923_v7 = vsel %vm498_vm0, %v920_v0, %v922_v56 }
 0x10c   : > { %v1192_v22 = vsel %vm2014_vm8, 0.0, %v923_v7  ;;  %v937_v44 = vsel %vm498_vm0, %v934_v34, %v936_v21 }
 0x10d   : > { %v734_v38 = vadd.f32 %v1876_v55, %v698_v36  ;;  %v781_v40 = vmax.f32 %v749_v37, 0.0  ;;  %v1208_v30 = vmax.f32 %v887_v26, %v1192_v22 }
 0x10e   : > { %v1995_v39 = vpop.f32.mrf.mxu1  ;;  %v581_v43 = vpop.f32.mrf.mxu2  ;;  %v2018_v9 = vld [vmem:[#allocation2 + $0xc1] ss:$2 sm:$0xff] }
 0x10f   : > { %v766_v42 = vmax.f32 %v734_v38, 0.0  ;;  %814 = vst.msk [vmem:[#allocation2 + $0xd0] sm:$0xff] %vm787_vm3, %v781_v40  ;;  %v671_v45 = vadd.f32 %v670_v33, %v581_v43  ;;  %v938_v23 = vrot.slane %v2018_v9, 7  ;;  %v1075_v33 = vand.u32 7, %v977_v15  ;;  %v844_v38 = vld [vmem:[#allocation2 + $0xc0] ss:$2 sm:$0xff] }
 0x110   : > { %v544_v46 = vpop.f32.mrf.mxu0  ;;  %v895_v62 = vmax.f32 %v844_v38, %v2018_v9 }
 0x111   : > { %799 = vst.msk [vmem:[#allocation2 + $0x58] sm:$0xff] %vm787_vm3, %v766_v42  ;;  %v634_v50 = vadd.f32 %v633_v13, %v544_v46  ;;  %v714_v54 = vmul.f32 %v1871_v52, %v671_v45  ;;  %v675_v31 = vpop.f32.mrf.mxu3  ;;  %v939_v40 = vsel %vm498_vm0, %v936_v21, %v938_v23  ;;  %vm2066_vm12 = vcmp.eq.s32.totalorder %v1075_v33, 0  ;;  %v2107_v33 = vld [vmem:[#allocation2 + $0x91] ss:$2 sm:$0xff] }
 0x112   : > { %v1200_v63 = vsel %vm2050_vm10, 0.0, %v939_v40  ;;  %v932_v40 = vrot.slane %v2107_v33, 7 }
 0x113   : > { %v699_v58 = vmul.f32 %v1871_v52, %v634_v50  ;;  %v750_v59 = vadd.f32 %v1876_v55, %v714_v54  ;;  %v842_v54 = vld [vmem:[#allocation2 + $0xb0] ss:$2 sm:$0xff] }
 0x114   : > { %v894_v9 = vmax.f32 %v842_v54, %v2009_v2 }
 0x115   : > { %v735_v48 = vadd.f32 %v1876_v55, %v699_v58  ;;  %v782_v5 = vmax.f32 %v750_v59, 0.0 }
 0x116   : > { %v2007_v51 = vpop.f32.mrf.mxu1  ;;  %v584_v12 = vpop.f32.mrf.mxu2 }
 0x117   : > { %v767_v10 = vmax.f32 %v735_v48, 0.0  ;;  %815 = vst.msk [vmem:[#allocation2 + $0xd8] sm:$0xff] %vm787_vm3, %v782_v5  ;;  %v674_v16 = vadd.f32 %v673_v49, %v584_v12  ;;  %v1216_v12 = vmax.f32 %v895_v62, %v1200_v63  ;;  %v978_v62 = vadd.s32 112, %v1895_v24 }
 0x118   : > { %v830_v13 = vld [vmem:[#allocation2 + $0x50] ss:$2 sm:$0xff]  ;;  %v2020_v14 = vld [vmem:[#allocation2 + $0x51] ss:$2 sm:$0xff]  ;;  %v546_v17 = vpop.f32.mrf.mxu0 }
 0x119   : > { %v924_v0 = vrot.slane %v2020_v14, 7  ;;  %800 = vst.msk [vmem:[#allocation2 + $0x60] sm:$0xff] %vm787_vm3, %v767_v10  ;;  %v636_v19 = vadd.f32 %v635_v28, %v546_v17  ;;  %v715_v25 = vmul.f32 %v1871_v52, %v674_v16  ;;  %v888_v27 = vmax.f32 %v830_v13, %v2020_v14  ;;  %v678_v17 = vpop.f32.mrf.mxu3 }
 0x11a   : > { %v1199_v10 = vsel %vm2058_vm11, 0.0, %v937_v44  ;;  %v935_v44 = vsel %vm498_vm0, %v932_v40, %v934_v34 }
 0x11b   : > { %v925_v29 = vsel %vm498_vm0, %v922_v56, %v924_v0  ;;  %v700_v28 = vmul.f32 %v1871_v52, %v636_v19  ;;  %v751_v1 = vadd.f32 %v1876_v55, %v715_v25  ;;  %v2096_v18 = vmax.f32 %v894_v9, %v1199_v10 }
 0x11c   : > { %v1193_v32 = vsel %vm2025_vm9, 0.0, %v925_v29 }
 0x11d   : > { %v2046_v35 = vmax.f32 %v888_v27, %v1193_v32  ;;  %v736_v36 = vadd.f32 %v1876_v55, %v700_v28  ;;  %v783_v42 = vmax.f32 %v751_v1, 0.0 }
 0x11e   : > { %v643_v37 = vpop.f32.mrf.mxu1  ;;  %v846_v47 = vld [vmem:[#allocation2 + $0xd0] ss:$2 sm:$0xff]  ;;  %v2063_v49 = vld [vmem:[#allocation2 + $0xd1] ss:$2 sm:$0xff]  ;;  %v586_v53 = vpop.f32.mrf.mxu2 }
 0x11f   : > { %v644_v43 = vadd.f32 %v643_v37, %v1880_v60  ;;  %v1223_v46 = vmax.f32 %v1208_v30, %v2046_v35  ;;  %v768_v50 = vmax.f32 %v736_v36, 0.0  ;;  %v940_v56 = vrot.slane %v2063_v49, 7  ;;  %816 = vst.msk [vmem:[#allocation2 + $0xe0] sm:$0xff] %vm787_vm3, %v783_v42 }
 0x120   : > { %v676_v58 = vadd.f32 %v675_v31, %v586_v53  ;;  %v549_v59 = vpop.f32.mrf.mxu0  ;;  %v896_v5 = vmax.f32 %v846_v47, %v2063_v49  ;;  %v973_v42 = vadd.s32 72, %v1895_v24  ;;  %v840_v53 = vld [vmem:[#allocation2 + $0xa0] ss:$2 sm:$0xff] }
 0x121   : > { %v703_v57 = vmul.f32 %v1871_v52, %v644_v43  ;;  %v1224_v48 = vmax.f32 %v1223_v46, %v1976_v11  ;;  %801 = vst.msk [vmem:[#allocation2 + $0x68] sm:$0xff] %vm787_vm3, %v768_v50  ;;  %v639_v3 = vadd.f32 %v1995_v39, %v549_v59  ;;  %v941_v6 = vsel %vm498_vm0, %v938_v23, %v940_v56  ;;  %v680_v46 = vpop.f32.mrf.mxu3 }
 0x122   : > { %v716_v8 = vmul.f32 %v1871_v52, %v676_v58  ;;  %v1201_v11 = vsel %vm2066_vm12, 0.0, %v941_v6  ;;  %v974_v23 = vadd.s32 80, %v1895_v24  ;;  %v971_v58 = vadd.s32 56, %v1895_v24  ;;  %v838_v6 = vld [vmem:[#allocation2 + $0x90] ss:$2 sm:$0xff] }
 0x123   : > { %v739_v7 = vadd.f32 %v1876_v55, %v703_v57  ;;  %v701_v39 = vmul.f32 %v1871_v52, %v639_v3  ;;  %1237 = vst.msk [vmem:[%s1934_s20 + $0x10] sm:$0xff] %vm787_vm3, %v1224_v48  ;;  %v2092_v13 = vmax.f32 %v896_v5, %v1201_v11  ;;  %v1026_v57 = vand.u32 7, %v970_v41 }
 0x124   : > { %v752_v16 = vadd.f32 %v1876_v55, %v716_v8  ;;  %v1054_v30 = vand.u32 7, %v974_v23  ;;  %v972_v59 = vadd.s32 64, %v1895_v24  ;;  %v1047_v63 = vand.u32 7, %v973_v42 }
 0x125   : > { %v771_v15 = vmax.f32 %v739_v7, 0.0  ;;  %v737_v61 = vadd.f32 %v1876_v55, %v701_v39  ;;  %v1231_v19 = vmax.f32 %v1216_v12, %v2092_v13  ;;  %v893_v3 = vmax.f32 %v840_v53, %v2030_v20 }
 0x126   : > { %v645_v2 = vpop.f32.mrf.mxu1  ;;  %v784_v21 = vmax.f32 %v752_v16, 0.0  ;;  %v589_v26 = vpop.f32.mrf.mxu2  ;;  %vm2123_vm13 = vcmp.eq.s32.totalorder %v1054_v30, 0  ;;  %vm2137_vm14 = vcmp.eq.s32.totalorder %v1026_v57, 0  ;;  %v1033_v11 = vand.u32 7, %v971_v58 }
 0x127   : > { %804 = vst.msk [vmem:[#allocation2 + $0x80] sm:$0xff] %vm787_vm3, %v771_v15  ;;  %v646_v22 = vadd.f32 %v645_v2, %v1885_v4  ;;  %v769_v25 = vmax.f32 %v737_v61, 0.0  ;;  %v1232_v27 = vmax.f32 %v1231_v19, %v2096_v18  ;;  %v679_v31 = vadd.f32 %v678_v17, %v589_v26 }
 0x128   : > { %817 = vst.msk [vmem:[#allocation2 + $0xe8] sm:$0xff] %vm787_vm3, %v784_v21  ;;  %v551_v28 = vpop.f32.mrf.mxu0  ;;  %v864_v54 = vld [vmem:[#allocation2 + $0x61] ss:$2 sm:$0xff]  ;;  %v1198_v34 = vsel %vm2123_vm13, 0.0, %v935_v44  ;;  %v1040_v39 = vand.u32 7, %v972_v59  ;;  %v1082_v12 = vand.u32 7, %v978_v62  ;;  %v892_v2 = vmax.f32 %v838_v6, %v2107_v33 }
 0x129   : > { %v704_v29 = vmul.f32 %v1871_v52, %v646_v22  ;;  %802 = vst.msk [vmem:[#allocation2 + $0x70] sm:$0xff] %vm787_vm3, %v769_v25  ;;  %v641_v32 = vadd.f32 %v2007_v51, %v551_v28  ;;  %v717_v1 = vmul.f32 %v1871_v52, %v679_v31  ;;  %v926_v5 = vrot.slane %v864_v54, 7  ;;  %v832_v20 = vld [vmem:[#allocation2 + $0x60] ss:$2 sm:$0xff] }
 0x12a   : > { %1241 = vst.msk [vmem:[%s1934_s20 + $0x30] sm:$0xff] %vm787_vm3, %v1232_v27  ;;  %v1214_v8 = vmax.f32 %v893_v3, %v1198_v34  ;;  %vm2141_vm15 = vcmp.eq.s32.totalorder %v1047_v63, 0  ;;  %v979_v25 = vadd.s32 120, %v1895_v24  ;;  %vm1179_vm1 = vcmp.eq.s32.totalorder %v1033_v11, 0 }
 0x12b   : > { %v740_v4 = vadd.f32 %v1876_v55, %v704_v29  ;;  %v702_v36 = vmul.f32 %v1871_v52, %v641_v32  ;;  %v753_v38 = vadd.f32 %v1876_v55, %v717_v1  ;;  %vm1180_vm2 = vcmp.eq.s32.totalorder %v1040_v39, 0 }
 0x12c   : > { %v1229_v19 = vmax.f32 %v1214_v8, %v2096_v18  ;;  %v1089_v1 = vand.u32 7, %v979_v25  ;;  %vm2162_vm4 = vcmp.eq.s32.totalorder %v1082_v12, 0 }
 0x12d   : > { %v772_v37 = vmax.f32 %v740_v4, 0.0  ;;  %v738_v51 = vadd.f32 %v1876_v55, %v702_v36  ;;  %v785_v43 = vmax.f32 %v753_v38, 0.0 }
 0x12e   : > { %v591_v50 = vpop.f32.mrf.mxu2  ;;  %vm1187_vm5 = vcmp.eq.s32.totalorder %v1089_v1, 0 }
 0x12f   : > { %805 = vst.msk [vmem:[#allocation2 + $0x88] sm:$0xff] %vm787_vm3, %v772_v37  ;;  %v770_v47 = vmax.f32 %v738_v51, 0.0  ;;  %v681_v60 = vadd.f32 %v680_v46, %v591_v50  ;;  %v880_v17 = vld [vmem:[#allocation2 + $0xe1] ss:$2 sm:$0xff]  ;;  %v848_v51 = vld [vmem:[#allocation2 + $0xe0] ss:$2 sm:$0xff] }
 0x130   : > { %818 = vst.msk [vmem:[#allocation2 + $0xf0] sm:$0xff] %vm787_vm3, %v785_v43  ;;  %v942_v18 = vrot.slane %v880_v17, 7  ;;  %v897_v50 = vmax.f32 %v848_v51, %v880_v17 }
 0x131   : > { %803 = vst.msk [vmem:[#allocation2 + $0x78] sm:$0xff] %vm787_vm3, %v770_v47  ;;  %v718_v48 = vmul.f32 %v1871_v52, %v681_v60 }
 0x133   : > { %v754_v7 = vadd.f32 %v1876_v55, %v718_v48  ;;  %v927_v55 = vsel %vm498_vm0, %v924_v0, %v926_v5  ;;  %v889_v0 = vmax.f32 %v832_v20, %v864_v54 }
 0x134   : > { %v1194_v27 = vsel %vm2137_vm14, 0.0, %v927_v55 }
 0x135   : > { %v786_v52 = vmax.f32 %v754_v7, 0.0  ;;  %v1210_v36 = vmax.f32 %v889_v0, %v1194_v27 }
 0x136   : > { %v868_v10 = vld [vmem:[#allocation2 + $0x81] ss:$2 sm:$0xff]  ;;  %v836_v61 = vld [vmem:[#allocation2 + $0x80] ss:$2 sm:$0xff] }
 0x137   : > { %v930_v15 = vrot.slane %v868_v10, 7  ;;  %819 = vst.msk [vmem:[#allocation2 + $0xf8] sm:$0xff] %vm787_vm3, %v786_v52  ;;  %v891_v31 = vmax.f32 %v836_v61, %v868_v10 }
 0x138   : > { %v834_v22 = vld [vmem:[#allocation2 + $0x70] ss:$2 sm:$0xff]  ;;  %v866_v23 = vld [vmem:[#allocation2 + $0x71] ss:$2 sm:$0xff] }
 0x139   : > { %v933_v21 = vsel %vm498_vm0, %v930_v15, %v932_v40  ;;  %v928_v14 = vrot.slane %v866_v23, 7  ;;  %v890_v28 = vmax.f32 %v834_v22, %v866_v23  ;;  %v943_v40 = vsel %vm498_vm0, %v940_v56, %v942_v18 }
 0x13a   : > { %v1197_v26 = vsel %vm2141_vm15, 0.0, %v933_v21  ;;  %v1202_v49 = vsel %vm2162_vm4, 0.0, %v943_v40 }
 0x13b   : > { %v1213_v29 = vmax.f32 %v892_v2, %v1197_v26  ;;  %v929_v32 = vsel %vm498_vm0, %v926_v5, %v928_v14  ;;  %v931_v24 = vsel %vm498_vm0, %v928_v14, %v930_v15  ;;  %v1218_v57 = vmax.f32 %v897_v50, %v1202_v49 }
 0x13c   : > { %v1195_v33 = vsel %vm1179_vm1, 0.0, %v929_v32  ;;  %v1196_v4 = vsel %vm1180_vm2, 0.0, %v931_v24 }
 0x13d   : > { %v1230_v30 = vmax.f32 %v1229_v19, %v1213_v29  ;;  %v1211_v37 = vmax.f32 %v890_v28, %v1195_v33  ;;  %v1212_v38 = vmax.f32 %v891_v31, %v1196_v4 }
 0x13e   : > { %v850_v44 = vld [vmem:[#allocation2 + $0xf0] ss:$2 sm:$0xff]  ;;  %v882_v45 = vld [vmem:[#allocation2 + $0xf1] ss:$2 sm:$0xff] }
 0x13f   : > { %1240 = vst.msk [vmem:[%s1934_s20 + $0x28] sm:$0xff] %vm787_vm3, %v1230_v30  ;;  %v1225_v42 = vmax.f32 %v1210_v36, %v1211_v37  ;;  %v1227_v43 = vmax.f32 %v1212_v38, %v1213_v29  ;;  %v944_v46 = vrot.slane %v882_v45, 7  ;;  %v898_v53 = vmax.f32 %v850_v44, %v882_v45 }
 0x141   : > { %v1226_v56 = vmax.f32 %v1225_v42, %v2046_v35  ;;  %v1228_v47 = vmax.f32 %v1227_v43, %v1211_v37  ;;  %v945_v54 = vsel %vm498_vm0, %v942_v18, %v944_v46 }
 0x142   : > { %v1203_v60 = vsel %vm1187_vm5, 0.0, %v945_v54 }
 0x143   : > { %1238 = vst.msk [vmem:[%s1934_s20 + $0x18] sm:$0xff] %vm787_vm3, %v1226_v56  ;;  %v1219_v58 = vmax.f32 %v898_v53, %v1203_v60 }
 0x144   : > { %1239 = vst.msk [vmem:[%s1934_s20 + $0x20] sm:$0xff] %vm787_vm3, %v1228_v47 }
 0x145   : > { %v1233_v35 = vmax.f32 %v1218_v57, %v1219_v58 }
 0x147   : > { %v1234_v59 = vmax.f32 %v1233_v35, %v2092_v13 }
 0x149   : > { %1242 = vst.msk [vmem:[%s1934_s20 + $0x38] sm:$0xff] %vm787_vm3, %v1234_v59 }
 0x14a   : > { %1637 = shalt.err (!%p1634_p3)
}
 0x14b   : > { %s1675_s12 = smov 128   ;;  %s1676_s13 = smov 8  }
 0x14c   : > { %1566 = dma.vmem_to_hbm [thread:$0]  (%p1740_p5), %s1257_s28, 1024, %s1259_s29, %s1244_s30, %s1675_s12, %s1675_s12, %s1676_s13  }
 0x14d PF: > { %p1572_p4 = scmp.ge.s32.totalorder %s1672_s18, 2  ;;  %s1273_s14 = sand.u32 1, %s1660_s15  }
 0x14e   : > { %s1274_s20 = scalar_lea.sflag [#allocation4], %s1273_s14 }
 0x14f   : > { %p1569_p7 = pnand %p1572_p4, %p1744_p6 }
 0x151   : > { %p1570_p8 = pneg %p1569_p7 }
 0x153   : > { %1655 = dma.done.wait (%p1570_p8), %s1274_s20, 1024  }
 0x154   : > { %1657 = vsyncadd (%p1570_p8), %s1274_s20, 4294966272  ;;  %p14_p9 = scmp.ge.s32.totalorder %s1727_s21, 4   ;;  %s2242_s15 = smov %s1664_s16 }
 0x155   : > { %s2243_s16 = smov %s1668_s17  ;;  %s2244_s17 = smov %s1738_s24 }
 0x156   : > { %s2245_s18 = smov %s1727_s21  ;;  %16 = sbr.rel (!%p14_p9) target bundleno = 3 (0x3), region = 102 }
 0x15b   :  { %1280 = vsyncpa [#allocation4], 1 }
 0x15c   :  { %1282 = vsyncpa [#allocation4 + $0x1], 1 }

</bundles_post_ra>
